<compile_context>
chip_gen: v7x
topology: tpu7x:2x2x1
jax: 0.10.0
libtpu: 0.0.40
codegen_flags: <defaults>
</compile_context>

<pallas_src>
import jax
import jax.numpy as jnp
from jax.experimental import pallas as pl
from jax.experimental.pallas import tpu as pltpu


# ----------------------------------------------------------------------------
# Pallas kernel: fused dual-head linear   out = x @ [w_reg | w_ext] + [b_reg | b_ext]
# ----------------------------------------------------------------------------

def _heads_kernel(x_ref, w_ref, b_ref, o_ref):
    # x: (TM, K) bf16, w: (K, Npad) bf16, b: (1, Npad) f32 -> o: (TM, Npad) f32
    acc = jnp.dot(x_ref[...], w_ref[...], preferred_element_type=jnp.float32)
    o_ref[...] = acc + b_ref[...]


def _round_up(v, m):
    return (v + m - 1) // m * m


def output_layer_forward(x, w_reg, b_reg, w_ext=None, b_ext=None):
    """OutputLayer.forward.

    x:      (B, C) float32
    w_reg:  (C, num_outputs), b_reg: (num_outputs,)
    w_ext:  (C, num_extra) or None, b_ext: (num_extra,) or None
    returns (regular_outputs (B, num_outputs) f32,
             extra_outputs   (B, num_extra)   f32 or None)
    """
    B, C = x.shape
    n_reg = w_reg.shape[1]
    n_extra = 0 if w_ext is None else w_ext.shape[1]

    # Merge the two heads into one matmul (single MXU pass, single store).
    if n_extra > 0:
        w = jnp.concatenate([w_reg, w_ext], axis=1)
        b = jnp.concatenate([b_reg, b_ext], axis=0)
    else:
        w, b = w_reg, b_reg
    n_total = n_reg + n_extra

    # Lane-dense / MXU-aligned padding (zeros: mathematically inert).
    c_pad = _round_up(C, 128)
    n_pad = _round_up(n_total, 128)

    # Row tiling: TM capped at 512 keeps the double-buffered working set
    # (2 bufs x [x tile + out tile] + resident weight) well under the 32 MiB
    # default scoped VMEM on v7x while reaching the HBM-roofline sweet spot.
    tm = 512 if B >= 512 else _round_up(B, 8)
    m_pad = _round_up(B, tm)

    x_p = jnp.pad(x, ((0, m_pad - B), (0, c_pad - C))).astype(jnp.bfloat16)
    w_p = jnp.pad(w, ((0, c_pad - C), (0, n_pad - n_total))).astype(jnp.bfloat16)
    b_p = jnp.pad(b.reshape(1, -1), ((0, 0), (0, n_pad - n_total))).astype(jnp.float32)

    grid = (m_pad // tm,)
    out = pl.pallas_call(
        _heads_kernel,
        out_shape=jax.ShapeDtypeStruct((m_pad, n_pad), jnp.float32),
        grid_spec=pltpu.PrefetchScalarGridSpec(
            num_scalar_prefetch=0,
            grid=grid,
            in_specs=[
                pl.BlockSpec((tm, c_pad), lambda i: (i, 0)),      # x row-tile
                pl.BlockSpec((c_pad, n_pad), lambda i: (0, 0)),   # fused weight (resident)
                pl.BlockSpec((1, n_pad), lambda i: (0, 0)),       # fused bias (resident)
            ],
            out_specs=pl.BlockSpec((tm, n_pad), lambda i: (i, 0)),
        ),
        compiler_params=pltpu.CompilerParams(
            dimension_semantics=("parallel",),   # shard row-tiles across TCs (v7x)
            vmem_limit_bytes=32 * 1024 * 1024,
        ),
    )(x_p, w_p, b_p)

    regular = out[:B, :n_reg]
    extra = None if n_extra == 0 else out[:B, n_reg:n_total]
    return regular, extra


# ----------------------------------------------------------------------------
# main
# ----------------------------------------------------------------------------

if __name__ == "__main__":
    B, C = 2, 32                 # batch, in_features
    NUM_OUTPUTS = 35             # regular head width (e.g. 5 lanes * 7 params)
    NUM_EXTRA = 10               # extra head width

    key = jax.random.PRNGKey(0)
    kx, kwr, kbr, kwe, kbe = jax.random.split(key, 5)
    x = jax.random.normal(kx, (B, C), jnp.float32)
    # nn.Linear-equivalent parameters, stored as (in, out) so forward is x @ W + b
    w_reg = jax.random.normal(kwr, (C, NUM_OUTPUTS), jnp.float32) / jnp.sqrt(C)
    b_reg = 0.01 * jax.random.normal(kbr, (NUM_OUTPUTS,), jnp.float32)
    w_ext = jax.random.normal(kwe, (C, NUM_EXTRA), jnp.float32) / jnp.sqrt(C)
    b_ext = 0.01 * jax.random.normal(kbe, (NUM_EXTRA,), jnp.float32)

    reg_out, extra_out = output_layer_forward(x, w_reg, b_reg, w_ext, b_ext)
    reg_out, extra_out = jax.block_until_ready((reg_out, extra_out))

    # pure-JAX reference (same bf16 operand rounding, f32 accumulation)
    xb = x.astype(jnp.bfloat16)
    ref_reg = jnp.dot(xb, w_reg.astype(jnp.bfloat16),
                      preferred_element_type=jnp.float32) + b_reg
    ref_ext = jnp.dot(xb, w_ext.astype(jnp.bfloat16),
                      preferred_element_type=jnp.float32) + b_ext

    assert reg_out.shape == (B, NUM_OUTPUTS)
    assert extra_out.shape == (B, NUM_EXTRA)
    assert bool(jnp.allclose(reg_out, ref_reg, atol=1e-2, rtol=1e-2))
    assert bool(jnp.allclose(extra_out, ref_ext, atol=1e-2, rtol=1e-2))
    assert bool(jnp.all(jnp.isfinite(reg_out))) and bool(jnp.all(jnp.isfinite(extra_out)))

    # num_extra == 0 path: extra_outputs must be None (matches PyTorch branch)
    reg_only, none_ext = output_layer_forward(x, w_reg, b_reg)
    reg_only = jax.block_until_ready(reg_only)
    assert none_ext is None and reg_only.shape == (B, NUM_OUTPUTS)
    assert bool(jnp.allclose(reg_only, ref_reg, atol=1e-2, rtol=1e-2))

    print("KERNEL_OK")
</pallas_src>

<mosaic_0001>
module attributes {stable_mosaic.version = 11 : i64} {
  func.func @_heads_kernel(%arg0: i32, %arg1: memref<8x128xbf16, #tpu.memory_space<vmem>>, %arg2: memref<128x128xbf16, #tpu.memory_space<vmem>>, %arg3: memref<1x128xf32, #tpu.memory_space<vmem>>, %arg4: memref<8x128xf32, #tpu.memory_space<vmem>>) attributes {dimension_semantics = [#tpu.dimension_semantics<parallel>], iteration_bounds = array<i64: 1>, scalar_prefetch = 0 : i64, scratch_operands = 0 : i64, tpu.core_type = #tpu.core_type<tc>, window_params = [{transform_indices = @transform_0, window_bounds = array<i64: 8, 128>}, {pipeline_mode = #tpu.pipeline_mode<synchronous>, transform_indices = @transform_1, window_bounds = array<i64: 128, 128>}, {pipeline_mode = #tpu.pipeline_mode<synchronous>, transform_indices = @transform_2, window_bounds = array<i64: 1, 128>}, {transform_indices = @transform_3, window_bounds = array<i64: 8, 128>}]} {
    %c0 = arith.constant 0 : index
    %c0_0 = arith.constant 0 : index
    %0 = vector.load %arg1[%c0, %c0_0] : memref<8x128xbf16, #tpu.memory_space<vmem>>, vector<8x128xbf16>
    %c0_1 = arith.constant 0 : index
    %c0_2 = arith.constant 0 : index
    %1 = vector.load %arg2[%c0_1, %c0_2] : memref<128x128xbf16, #tpu.memory_space<vmem>>, vector<128x128xbf16>
    %cst = arith.constant dense<0.000000e+00> : vector<8x128xf32>
    %2 = tpu.matmul %0, %1, %cst {dimension_numbers = #tpu.dot_dimension_numbers<[1], [0], [0], [1], [0, 0, 1, 1], [], []>} : vector<8x128xbf16>, vector<128x128xbf16>, vector<8x128xf32> -> vector<8x128xf32>
    %c0_3 = arith.constant 0 : index
    %c0_4 = arith.constant 0 : index
    %3 = vector.load %arg3[%c0_3, %c0_4] : memref<1x128xf32, #tpu.memory_space<vmem>>, vector<1x128xf32>
    %4 = vector.broadcast %3 : vector<1x128xf32> to vector<8x128xf32>
    %5 = arith.addf %2, %4 : vector<8x128xf32>
    %c0_5 = arith.constant 0 : index
    %c0_6 = arith.constant 0 : index
    %6 = vector.load %arg4[%c0_5, %c0_6] : memref<8x128xf32, #tpu.memory_space<vmem>>, vector<8x128xf32>
    tpu.vector_store %arg4[%c0_5, %c0_6], %5 {strides = array<i32>} : memref<8x128xf32, #tpu.memory_space<vmem>>, vector<8x128xf32>,
    return
  }
  func.func @transform_0(%arg0: i32) -> (i32, i32) {
    %c0_i32 = arith.constant 0 : i32
    %c0_i32_0 = arith.constant 0 : i32
    return %arg0, %c0_i32 : i32, i32
  }
  func.func @transform_1(%arg0: i32) -> (i32, i32) {
    %c0_i32 = arith.constant 0 : i32
    %c0_i32_0 = arith.constant 0 : i32
    %c0_i32_1 = arith.constant 0 : i32
    return %c0_i32, %c0_i32_0 : i32, i32
  }
  func.func @transform_2(%arg0: i32) -> (i32, i32) {
    %c0_i32 = arith.constant 0 : i32
    %c0_i32_0 = arith.constant 0 : i32
    %c0_i32_1 = arith.constant 0 : i32
    return %c0_i32, %c0_i32_0 : i32, i32
  }
  func.func @transform_3(%arg0: i32) -> (i32, i32) {
    %c0_i32 = arith.constant 0 : i32
    %c0_i32_0 = arith.constant 0 : i32
    return %arg0, %c0_i32 : i32, i32
  }
}

</mosaic_0001>

<bundles_post_ra>
// kernel: tpu_custom_call.1
= control target key start
LH: loop header
LB: loop body
LE: loop exit
PB: predicated region body
PF: predicated region fallthrough
CT: control target
= control target key end

     0   :  { %8 = vsyncpa [#allocation3], 0  ;;  %s369_s0 = inlined_call_operand.hbm [shape: bf16[8,128], index: 0, kind: input, shape index: {}]   ;;  %s370_s1 = inlined_call_operand.hbm [shape: bf16[128,128], index: 1, kind: input, shape index: {}]   ;;  %s371_s2 = inlined_call_operand.vmem [shape: f32[1,128], index: 2, kind: input, shape index: {}]   ;;  %s372_s3 = inlined_call_operand.hbm [shape: f32[8,128], index: 3, kind: output, shape index: {}]  }
   0x1   :  { %9 = vsyncpa [#allocation6], 0 }
   0x2   :  { %10 = vsyncpa [#allocation4], 0  ;;  %s296_s12 = smov [#allocation2]   ;;  %s297_s14 = smov [#allocation5]  }
   0x3   :  { %s17_s13 = sshll.u32 %s296_s12, 4  ;;  %s26_s15 = sshll.u32 %s297_s14, 4  ;;  %s18_s13 = int_to_ptr.vmem [resolvable:$true] %s17_s13  ;;  %s323_s15 = int_to_ptr.vmem [resolvable:$true] %s26_s15 }
   0x4   :  { %s224_s18 = scalar_lea.hbm %s369_s0, 64 }
   0x5   :  { %p225_p0 = scmp.ne.s32.totalorder %s369_s0, %s224_s18  ;;  %p228_p1 = scmp.lt.u32.totalorder %s224_s18, %s369_s0 }
   0x7   :  { %p230_p2 = pnand %p228_p1, %p225_p0 }
   0x9   :  { %233 = shalt.err (!%p230_p2)
}
   0xa   :  { %s234_s23 = scalar_lea.vmem %s18_s13, 64  ;;  %p239_p4 = scmp.lt.s32.totalorder %s18_s13, %s18_s13 }
   0xb   :  { %p235_p3 = scmp.ne.s32.totalorder %s18_s13, %s234_s23  ;;  %p240_p5 = scmp.lt.s32.totalorder %s234_s23, %s234_s23 }
   0xd   :  { %p241_p6 = por %p240_p5, %p239_p4 }
   0xf   :  { %p242_p7 = pnand %p241_p6, %p235_p3 }
  0x11   :  { %245 = shalt.err (!%p242_p7)
}
  0x12   :  { %20 = dma.hbm_to_vmem [thread:$0]  %s369_s0, 64, %s18_s13, [#allocation3]  }
  0x13   :  { %s246_s28 = scalar_lea.hbm %s370_s1, 1024 }
  0x14   :  { %p247_p8 = scmp.ne.s32.totalorder %s370_s1, %s246_s28  ;;  %p250_p9 = scmp.lt.u32.totalorder %s246_s28, %s370_s1 }
  0x16   :  { %p252_p10 = pnand %p250_p9, %p247_p8 }
  0x18   :  { %255 = shalt.err (!%p252_p10)
}
  0x19   :  { %s256_s6 = scalar_lea.vmem %s323_s15, 1024  ;;  %p261_p12 = scmp.lt.s32.totalorder %s323_s15, %s323_s15 }
  0x1a   :  { %p257_p11 = scmp.ne.s32.totalorder %s323_s15, %s256_s6  ;;  %p262_p13 = scmp.lt.s32.totalorder %s256_s6, %s256_s6 }
  0x1c   :  { %p263_p0 = por %p262_p13, %p261_p12 }
  0x1e   :  { %p264_p1 = pnand %p263_p0, %p257_p11 }
  0x20   :  { %267 = shalt.err (!%p264_p1)
}
  0x21   :  { %s298_s0 = smov 64   ;;  %s299_s7 = smov 4  }
  0x22   :  { %32 = dma.hbm_to_vmem [thread:$0]  %s370_s1, 1024, %s323_s15, [#allocation6], %s298_s0, %s298_s0, %s299_s7  }
  0x23   :  { %290 = dma.done.wait [#allocation3], 64  }
  0x24   :  { %291 = vsyncadd [#allocation3], 4294967232 }
  0x25   :  { %292 = dma.done.wait [#allocation6], 1024  }
  0x26   :  { %293 = vsyncadd [#allocation6], 4294966272  ;;  %v300_v0 = vmov 0.0   ;;  %vm301_vm0 = vmmov 0   ;;  %v216_v1 = vld [vmem:[#allocation5] sm:$0xff]   ;;  %v217_v2 = vld [vmem:[#allocation5 + $0x8] sm:$0xff]  }
  0x27   :  { %189 = vmatprep.subr.bf16.mxu0 %v300_v0  ;;  %205 = vmatprep.mubr.msk.bf16.mxu0 %vm301_vm0, %v300_v0  ;;  %v218_v3 = vld [vmem:[#allocation5 + $0x10] sm:$0xff]   ;;  %v219_v4 = vld [vmem:[#allocation5 + $0x18] sm:$0xff]   ;;  %v220_v5 = vld [vmem:[#allocation5 + $0x20] sm:$0xff]   ;;  %s302_s11 = smov [#allocation7]  }
  0x28   :  { %190 = vmatpush3.bf16.msra.mxu0 %v216_v1  ;;  %v221_v6 = vld [vmem:[#allocation5 + $0x28] sm:$0xff]   ;;  %v222_v7 = vld [vmem:[#allocation5 + $0x30] sm:$0xff]   ;;  %v223_v8 = vld [vmem:[#allocation5 + $0x38] sm:$0xff]   ;;  %s161_s12 = sshll.u32 %s302_s11, 4  ;;  %s162_s12 = int_to_ptr.vmem [resolvable:$true] %s161_s12 }
  0x29   :  { %191 = vmatprep.subr.bf16.mxu0 %v300_v0  ;;  %v42_v9 = vld [vmem:[#allocation2] sm:$0xf]  ;;  %s268_s13 = scalar_lea.vmem %s162_s12, 128  ;;  %p273_p3 = scmp.lt.s32.totalorder %s162_s12, %s162_s12 }
  0x2a   :  { %v171_v10 = vld [vmem:[%s371_s2] ss:$0 sm:$0xff]  ;;  %p269_p2 = scmp.ne.s32.totalorder %s162_s12, %s268_s13  ;;  %p274_p4 = scmp.lt.s32.totalorder %s268_s13, %s268_s13 }
  0x2c   :  { %192 = vmatpush3.bf16.msra.mxu0 %v217_v2  ;;  %p275_p5 = por %p274_p4, %p273_p3 }
  0x2d   :  { %193 = vmatprep.subr.bf16.mxu0 %v300_v0 }
  0x2e   :  { %p276_p6 = pnand %p275_p5, %p269_p2 }
  0x30   :  { %194 = vmatpush3.bf16.msra.mxu0 %v218_v3 }
  0x31   :  { %195 = vmatprep.subr.bf16.mxu0 %v300_v0 }
  0x34   :  { %196 = vmatpush3.bf16.msra.mxu0 %v219_v4 }
  0x35   :  { %197 = vmatprep.subr.bf16.mxu0 %v300_v0 }
  0x38   :  { %198 = vmatpush3.bf16.msra.mxu0 %v220_v5 }
  0x39   :  { %199 = vmatprep.subr.bf16.mxu0 %v300_v0 }
  0x3c   :  { %200 = vmatpush3.bf16.msra.mxu0 %v221_v6 }
  0x3d   :  { %201 = vmatprep.subr.bf16.mxu0 %v300_v0 }
  0x40   :  { %202 = vmatpush3.bf16.msra.mxu0 %v222_v7 }
  0x41   :  { %203 = vmatprep.subr.bf16.mxu0 %v300_v0 }
  0x44   :  { %204 = vmatpush3.bf16.msra.mxu0 %v223_v8 }
  0x47   :  { %206 = vmatmul.mubr.bf16.vlgmr.msra.gmra.mrb[0].mxu0 %v42_v9 }
 0x11a   :  { %v148_v11 = vpop.f32.mrb[0].mxu0 }
 0x11b   :  { %v149_v12 = vadd.f32 %v171_v10, %v148_v11  ;;  %v207_v13 = vpop.f32.mrb[1].mxu0 }
 0x11c   :  { %v151_v14 = vpop.f32.mrb[2].mxu0 }
 0x11d   :  { %154 = vst [vmem:[#allocation7] sm:$0xff] %v149_v12  ;;  %v208_v15 = vpop.f32.mrb[3].mxu0 }
 0x11e   :  { %279 = shalt.err (!%p276_p6)
}
 0x11f   :  { %s280_s2 = scalar_lea.hbm %s372_s3, 128 }
 0x120   :  { %p281_p7 = scmp.ne.s32.totalorder %s372_s3, %s280_s2  ;;  %p284_p8 = scmp.lt.u32.totalorder %s280_s2, %s372_s3 }
 0x122   :  { %p286_p9 = pnand %p284_p8, %p281_p7 }
 0x124   :  { %289 = shalt.err (!%p286_p9)
}
 0x125   :  { %164 = dma.vmem_to_hbm [thread:$0]  %s162_s12, 128, %s372_s3, [#allocation4]  }
 0x126   :  { %294 = dma.done.wait [#allocation4], 128  }
 0x127   :  { %295 = vsyncadd [#allocation4], 4294967168 }
 0x128   :  { %168 = vsyncpa [#allocation3], 1 }
 0x129   :  { %169 = vsyncpa [#allocation6], 1 }
 0x12a   :  { %170 = vsyncpa [#allocation4], 1 }

</bundles_post_ra>
